<compile_context>
chip_gen: v6e
topology: v6e:2x2x1
jax: 0.10.0
libtpu: 0.0.40
codegen_flags: <defaults>
</compile_context>

<pallas_src>
from functools import partial

import jax
import jax.numpy as jnp
from jax.experimental import pallas as pl
from jax.experimental.pallas import tpu as pltpu


# ----------------------------------------------------------------------------
# helpers
# ----------------------------------------------------------------------------
def _round_up(x, m):
    return ((x + m - 1) // m) * m


def _pick_spatial_tile(s, cap=512):
    """Largest tile <= cap that divides s and is a multiple of 8 (or s itself)."""
    if s <= cap:
        return s
    for d in range(cap, 7, -1):
        if s % d == 0 and d % 8 == 0:
            return d
    return s  # fallback: whole axis (still correct, just one big block)


def _im2col_3x3_s2(x_nhwc):
    """3x3 stride-2 'same' patches, channel order (kh, kw, cin)."""
    B, H, W, C = x_nhwc.shape
    Ho, Wo = H // 2, W // 2
    xp = jnp.pad(x_nhwc, ((0, 0), (1, 1), (1, 1), (0, 0)))
    patches = []
    for kh in range(3):
        for kw in range(3):
            patches.append(xp[:, kh:kh + 2 * Ho:2, kw:kw + 2 * Wo:2, :])
    patches = jnp.concatenate(patches, axis=-1)          # (B, Ho, Wo, 9*C)
    return patches, (B, Ho, Wo)


# ----------------------------------------------------------------------------
# Fused kernel: stem matmul+swish -> proj matmul+swish -> pooled-sum
#               accumulate -> (at last tile) classifier + write.
# ----------------------------------------------------------------------------
def _fused_forward_kernel(x_ref, sw_ref, sb_ref, pw_ref, pb_ref, fcw_ref,
                          fcb_ref, o_ref, acc_ref):
    s = pl.program_id(1)

    @pl.when(s == 0)
    def _():
        acc_ref[...] = jnp.zeros_like(acc_ref)

    x = x_ref[0]                                            # (TS, K_pad) bf16
    # stem 3x3/s2 conv as matmul (MXU, bf16 in / f32 acc) + bias + swish
    h = jnp.dot(x, sw_ref[...], preferred_element_type=jnp.float32)
    h = h + sb_ref[...]
    h = h * jax.nn.sigmoid(h)
    # 1x1 projection to feature width + bias + swish
    h2 = jnp.dot(h.astype(jnp.bfloat16), pw_ref[...],
                 preferred_element_type=jnp.float32)
    h2 = h2 + pb_ref[...]
    h2 = h2 * jax.nn.sigmoid(h2)
    # partial spatial sum for this tile -> per-batch accumulator
    acc_ref[...] += jnp.sum(h2, axis=0, keepdims=True)      # (1, F_pad)

    @pl.when(s == pl.num_programs(1) - 1)
    def _():
        # classifier: mean-scale already folded into fcw (wrapper); VPU mul
        # + cross-lane reduce instead of a N=1 MXU matmul.
        val = jnp.sum(acc_ref[...] * fcw_ref[...]) + fcb_ref[0]
        o_ref[...] = jnp.full((1, 1, 128), val, dtype=o_ref.dtype)


# ----------------------------------------------------------------------------
# Model forward
# ----------------------------------------------------------------------------
def model_forward(x_nchw, stem_w, stem_b, proj_w, proj_b, fc_w, fc_b,
                  *, spatial_tile_cap=512):
    # NCHW -> NHWC
    x = jnp.transpose(x_nchw, (0, 2, 3, 1))
    B, H, W, C = x.shape

    patches, (_, Ho, Wo) = _im2col_3x3_s2(x)                # (B, Ho, Wo, 9C)
    S = Ho * Wo
    K = 9 * C
    C_stem = stem_w.shape[-1]
    F = proj_w.shape[-1]

    # lane-aligned padded widths
    K_pad = _round_up(K, 128)
    Cs_pad = _round_up(C_stem, 128)
    F_pad = _round_up(F, 128)

    cols = patches.reshape(B, S, K)
    cols_p = jnp.pad(cols, ((0, 0), (0, 0), (0, K_pad - K))).astype(jnp.bfloat16)

    stem_wm = stem_w.reshape(K, C_stem)                     # (kh, kw, cin) rows
    stem_w_p = jnp.pad(stem_wm, ((0, K_pad - K), (0, Cs_pad - C_stem))
                       ).astype(jnp.bfloat16)
    stem_b_p = jnp.pad(stem_b, (0, Cs_pad - C_stem)).reshape(1, Cs_pad
                       ).astype(jnp.float32)
    proj_w_p = jnp.pad(proj_w, ((0, Cs_pad - C_stem), (0, F_pad - F))
                       ).astype(jnp.bfloat16)
    proj_b_p = jnp.pad(proj_b, (0, F_pad - F)).reshape(1, F_pad
                       ).astype(jnp.float32)
    # fold the 1/(H*W) mean into the classifier weight (wrapper-side)
    fcw_p = jnp.pad(fc_w[:, 0] / float(S), (0, F_pad - F)).reshape(1, F_pad
                    ).astype(jnp.float32)
    fcb = fc_b.astype(jnp.float32)                          # (1,) scalar -> SMEM

    TS = _pick_spatial_tile(S, cap=spatial_tile_cap)
    assert S % TS == 0
    grid = (B, S // TS)

    cost = pl.CostEstimate(
        flops=int(2 * B * S * (K_pad * Cs_pad + Cs_pad * F_pad) + 2 * B * F_pad),
        transcendentals=int(B * S * (Cs_pad + F_pad)),
        bytes_accessed=int(cols_p.size * 2 + stem_w_p.size * 2
                           + proj_w_p.size * 2
                           + (stem_b_p.size + proj_b_p.size + fcw_p.size) * 4
                           + B * 128 * 4),
    )

    out = pl.pallas_call(
        _fused_forward_kernel,
        out_shape=jax.ShapeDtypeStruct((B, 1, 128), jnp.float32),
        grid_spec=pltpu.PrefetchScalarGridSpec(
            num_scalar_prefetch=0,
            grid=grid,
            in_specs=[
                pl.BlockSpec((1, TS, K_pad), lambda b, s: (b, s, 0)),
                pl.BlockSpec((K_pad, Cs_pad), lambda b, s: (0, 0)),
                pl.BlockSpec((1, Cs_pad), lambda b, s: (0, 0)),
                pl.BlockSpec((Cs_pad, F_pad), lambda b, s: (0, 0)),
                pl.BlockSpec((1, F_pad), lambda b, s: (0, 0)),
                pl.BlockSpec((1, F_pad), lambda b, s: (0, 0)),
                pl.BlockSpec(memory_space=pltpu.MemorySpace.SMEM),
            ],
            out_specs=pl.BlockSpec((1, 1, 128), lambda b, s: (b, 0, 0)),
            scratch_shapes=[pltpu.VMEM((1, F_pad), jnp.float32)],
        ),
        compiler_params=pltpu.CompilerParams(
            dimension_semantics=("parallel", "arbitrary"),
            vmem_limit_bytes=64 * 1024 * 1024,
        ),
        cost_estimate=cost,
    )(cols_p, stem_w_p, stem_b_p, proj_w_p, proj_b_p, fcw_p, fcb)

    return out[:, 0, :1]                                    # (B, 1)


# ----------------------------------------------------------------------------
if __name__ == "__main__":
    key = jax.random.PRNGKey(0)
    B, C_IN, H, W = 2, 3, 16, 16
    C_STEM = 8        # stand-in for the EfficientNet stem width
    F_FEAT = 32       # stand-in for EfficientNet-b0's `_fc.in_features`

    k1, k2, k3, k4, kx = jax.random.split(key, 5)
    x = jax.random.normal(kx, (B, C_IN, H, W), jnp.float32)
    stem_w = 0.1 * jax.random.normal(k1, (3, 3, C_IN, C_STEM), jnp.float32)
    stem_b = jnp.zeros((C_STEM,), jnp.float32)
    proj_w = 0.1 * jax.random.normal(k2, (C_STEM, F_FEAT), jnp.float32)
    proj_b = jnp.zeros((F_FEAT,), jnp.float32)
    fc_w = 0.1 * jax.random.normal(k3, (F_FEAT, 1), jnp.float32)
    fc_b = 0.1 * jax.random.normal(k4, (1,), jnp.float32)

    out = model_forward(x, stem_w, stem_b, proj_w, proj_b, fc_w, fc_b)
    out = jax.block_until_ready(out)
    assert out.shape == (B, 1) and out.dtype == jnp.float32

    # pure-JAX reference of the same stand-in network, mirroring the kernel's
    # bf16 input/weight rounding (f32 accumulation).
    xr = jnp.transpose(x, (0, 2, 3, 1))
    patches, (_, Ho, Wo) = _im2col_3x3_s2(xr)
    cols = patches.reshape(B, Ho * Wo, 9 * C_IN)
    cb = cols.astype(jnp.bfloat16).astype(jnp.float32)
    swb = stem_w.reshape(9 * C_IN, C_STEM).astype(jnp.bfloat16).astype(jnp.float32)
    hr = cb @ swb + stem_b
    hr = hr * jax.nn.sigmoid(hr)
    pwb = proj_w.astype(jnp.bfloat16).astype(jnp.float32)
    h2r = hr.astype(jnp.bfloat16).astype(jnp.float32) @ pwb + proj_b
    h2r = h2r * jax.nn.sigmoid(h2r)
    pooled = jnp.mean(h2r, axis=1)                          # (B, F_FEAT)
    ref = pooled @ fc_w + fc_b

    assert jnp.allclose(out, ref, atol=1e-2, rtol=1e-2), (out, ref)
    print("KERNEL_OK")
</pallas_src>

<mosaic_0001>
module attributes {stable_mosaic.version = 11 : i64} {
  func.func @_fused_forward_kernel(%arg0: i32, %arg1: i32, %arg2: memref<1x64x128xbf16, #tpu.memory_space<vmem>>, %arg3: memref<128x128xbf16, #tpu.memory_space<vmem>>, %arg4: memref<1x128xf32, #tpu.memory_space<vmem>>, %arg5: memref<128x128xbf16, #tpu.memory_space<vmem>>, %arg6: memref<1x128xf32, #tpu.memory_space<vmem>>, %arg7: memref<1x128xf32, #tpu.memory_space<vmem>>, %arg8: memref<1xf32, #tpu.memory_space<smem>>, %arg9: memref<1x1x128xf32, #tpu.memory_space<vmem>>, %arg10: memref<1x128xf32, #tpu.memory_space<vmem>>) attributes {dimension_semantics = [#tpu.dimension_semantics<parallel>, #tpu.dimension_semantics<arbitrary>], iteration_bounds = array<i64: 2, 1>, scalar_prefetch = 0 : i64, scratch_operands = 1 : i64, tpu.core_type = #tpu.core_type<tc>, window_params = [{transform_indices = @transform_0, window_bounds = array<i64: 1, 64, 128>}, {pipeline_mode = #tpu.pipeline_mode<synchronous>, transform_indices = @transform_1, window_bounds = array<i64: 128, 128>}, {pipeline_mode = #tpu.pipeline_mode<synchronous>, transform_indices = @transform_2, window_bounds = array<i64: 1, 128>}, {pipeline_mode = #tpu.pipeline_mode<synchronous>, transform_indices = @transform_3, window_bounds = array<i64: 128, 128>}, {pipeline_mode = #tpu.pipeline_mode<synchronous>, transform_indices = @transform_4, window_bounds = array<i64: 1, 128>}, {pipeline_mode = #tpu.pipeline_mode<synchronous>, transform_indices = @transform_5, window_bounds = array<i64: 1, 128>}, {transform_indices = @transform_6, window_bounds = array<i64: 1>}, {transform_indices = @transform_7, window_bounds = array<i64: 1, 1, 128>}]} {
    %c0_i32 = arith.constant 0 : i32
    %0 = arith.cmpi eq, %arg1, %c0_i32 : i32
    %1 = arith.extui %0 : i1 to i32
    %c0_i32_0 = arith.constant 0 : i32
    %2 = arith.cmpi ne, %1, %c0_i32_0 : i32
    scf.if %2 {
      %cst_21 = arith.constant 0.000000e+00 : f32
      %36 = vector.broadcast %cst_21 : f32 to vector<1x128xf32>
      %c0_22 = arith.constant 0 : index
      %c0_23 = arith.constant 0 : index
      %37 = vector.load %arg10[%c0_22, %c0_23] : memref<1x128xf32, #tpu.memory_space<vmem>>, vector<1x128xf32>
      tpu.vector_store %arg10[%c0_22, %c0_23], %36 {strides = array<i32>} : memref<1x128xf32, #tpu.memory_space<vmem>>, vector<1x128xf32>,
    } else {
    }
    %c0 = arith.constant 0 : index
    %c0_1 = arith.constant 0 : index
    %c0_2 = arith.constant 0 : index
    %3 = vector.load %arg2[%c0, %c0_1, %c0_2] : memref<1x64x128xbf16, #tpu.memory_space<vmem>>, vector<1x64x128xbf16>
    %4 = vector.shape_cast %3 : vector<1x64x128xbf16> to vector<64x128xbf16>
    %c0_3 = arith.constant 0 : index
    %c0_4 = arith.constant 0 : index
    %5 = vector.load %arg3[%c0_3, %c0_4] : memref<128x128xbf16, #tpu.memory_space<vmem>>, vector<128x128xbf16>
    %cst = arith.constant dense<0.000000e+00> : vector<64x128xf32>
    %6 = tpu.matmul %4, %5, %cst {dimension_numbers = #tpu.dot_dimension_numbers<[1], [0], [0], [1], [0, 0, 1, 1], [], []>} : vector<64x128xbf16>, vector<128x128xbf16>, vector<64x128xf32> -> vector<64x128xf32>
    %c0_5 = arith.constant 0 : index
    %c0_6 = arith.constant 0 : index
    %7 = vector.load %arg4[%c0_5, %c0_6] : memref<1x128xf32, #tpu.memory_space<vmem>>, vector<1x128xf32>
    %8 = vector.broadcast %7 : vector<1x128xf32> to vector<64x128xf32>
    %9 = arith.addf %6, %8 : vector<64x128xf32>
    %10 = arith.negf %9 : vector<64x128xf32>
    %11 = math.exp %10 : vector<64x128xf32>
    %cst_7 = arith.constant 1.000000e+00 : f32
    %12 = vector.broadcast %cst_7 : f32 to vector<64x128xf32>
    %13 = arith.addf %12, %11 : vector<64x128xf32>
    %14 = arith.divf %12, %13 : vector<64x128xf32>
    %15 = arith.mulf %9, %14 : vector<64x128xf32>
    %16 = arith.truncf %15 : vector<64x128xf32> to vector<64x128xbf16>
    %c0_8 = arith.constant 0 : index
    %c0_9 = arith.constant 0 : index
    %17 = vector.load %arg5[%c0_8, %c0_9] : memref<128x128xbf16, #tpu.memory_space<vmem>>, vector<128x128xbf16>
    %cst_10 = arith.constant dense<0.000000e+00> : vector<64x128xf32>
    %18 = tpu.matmul %16, %17, %cst_10 {dimension_numbers = #tpu.dot_dimension_numbers<[1], [0], [0], [1], [0, 0, 1, 1], [], []>} : vector<64x128xbf16>, vector<128x128xbf16>, vector<64x128xf32> -> vector<64x128xf32>
    %c0_11 = arith.constant 0 : index
    %c0_12 = arith.constant 0 : index
    %19 = vector.load %arg6[%c0_11, %c0_12] : memref<1x128xf32, #tpu.memory_space<vmem>>, vector<1x128xf32>
    %20 = vector.broadcast %19 : vector<1x128xf32> to vector<64x128xf32>
    %21 = arith.addf %18, %20 : vector<64x128xf32>
    %22 = arith.negf %21 : vector<64x128xf32>
    %23 = math.exp %22 : vector<64x128xf32>
    %cst_13 = arith.constant 1.000000e+00 : f32
    %24 = vector.broadcast %cst_13 : f32 to vector<64x128xf32>
    %25 = arith.addf %24, %23 : vector<64x128xf32>
    %26 = arith.divf %24, %25 : vector<64x128xf32>
    %27 = arith.mulf %21, %26 : vector<64x128xf32>
    %c0_14 = arith.constant 0 : index
    %c0_15 = arith.constant 0 : index
    %28 = vector.load %arg10[%c0_14, %c0_15] : memref<1x128xf32, #tpu.memory_space<vmem>>, vector<1x128xf32>
    %cst_16 = arith.constant dense<0.000000e+00> : vector<128xf32>
    %29 = vector.multi_reduction <add>, %27, %cst_16 [0] : vector<64x128xf32> to vector<128xf32>
    %30 = vector.shape_cast %29 : vector<128xf32> to vector<1x128xf32>
    %31 = arith.addf %28, %30 : vector<1x128xf32>
    %c0_17 = arith.constant 0 : index
    %c0_18 = arith.constant 0 : index
    %32 = vector.load %arg10[%c0_17, %c0_18] : memref<1x128xf32, #tpu.memory_space<vmem>>, vector<1x128xf32>
    tpu.vector_store %arg10[%c0_17, %c0_18], %31 {strides = array<i32>} : memref<1x128xf32, #tpu.memory_space<vmem>>, vector<1x128xf32>,
    %c0_i32_19 = arith.constant 0 : i32
    %33 = arith.cmpi eq, %arg1, %c0_i32_19 : i32
    %34 = arith.extui %33 : i1 to i32
    %c0_i32_20 = arith.constant 0 : i32
    %35 = arith.cmpi ne, %34, %c0_i32_20 : i32
    scf.if %35 {
      %c0_21 = arith.constant 0 : index
      %c0_22 = arith.constant 0 : index
      %36 = vector.load %arg10[%c0_21, %c0_22] : memref<1x128xf32, #tpu.memory_space<vmem>>, vector<1x128xf32>
      %c0_23 = arith.constant 0 : index
      %c0_24 = arith.constant 0 : index
      %37 = vector.load %arg7[%c0_23, %c0_24] : memref<1x128xf32, #tpu.memory_space<vmem>>, vector<1x128xf32>
      %38 = arith.mulf %36, %37 : vector<1x128xf32>
      %39 = vector.shape_cast %38 : vector<1x128xf32> to vector<1x1x128xf32>
      %cst_25 = arith.constant dense<0.000000e+00> : vector<1xf32>
      %40 = vector.multi_reduction <add>, %39, %cst_25 [1, 2] : vector<1x1x128xf32> to vector<1xf32>
      %41 = vector.shape_cast %40 : vector<1xf32> to vector<1x1x1xf32>
      %42 = vector.extract %41[0, 0, 0] : f32 from vector<1x1x1xf32>
      %c0_26 = arith.constant 0 : index
      %43 = memref.load %arg8[%c0_26] : memref<1xf32, #tpu.memory_space<smem>>
      %44 = arith.addf %42, %43 : f32
      %45 = vector.broadcast %44 : f32 to vector<1x1x128xf32>
      %c0_27 = arith.constant 0 : index
      %c0_28 = arith.constant 0 : index
      %c0_29 = arith.constant 0 : index
      %46 = vector.load %arg9[%c0_27, %c0_28, %c0_29] : memref<1x1x128xf32, #tpu.memory_space<vmem>>, vector<1x1x128xf32>
      tpu.vector_store %arg9[%c0_27, %c0_28, %c0_29], %45 {strides = array<i32>} : memref<1x1x128xf32, #tpu.memory_space<vmem>>, vector<1x1x128xf32>,
    } else {
    }
    return
  }
  func.func @transform_0(%arg0: i32, %arg1: i32) -> (i32, i32, i32) {
    %c0_i32 = arith.constant 0 : i32
    %c0_i32_0 = arith.constant 0 : i32
    return %arg0, %arg1, %c0_i32 : i32, i32, i32
  }
  func.func @transform_1(%arg0: i32, %arg1: i32) -> (i32, i32) {
    %c0_i32 = arith.constant 0 : i32
    %c0_i32_0 = arith.constant 0 : i32
    %c0_i32_1 = arith.constant 0 : i32
    return %c0_i32, %c0_i32_0 : i32, i32
  }
  func.func @transform_2(%arg0: i32, %arg1: i32) -> (i32, i32) {
    %c0_i32 = arith.constant 0 : i32
    %c0_i32_0 = arith.constant 0 : i32
    %c0_i32_1 = arith.constant 0 : i32
    return %c0_i32, %c0_i32_0 : i32, i32
  }
  func.func @transform_3(%arg0: i32, %arg1: i32) -> (i32, i32) {
    %c0_i32 = arith.constant 0 : i32
    %c0_i32_0 = arith.constant 0 : i32
    %c0_i32_1 = arith.constant 0 : i32
    return %c0_i32, %c0_i32_0 : i32, i32
  }
  func.func @transform_4(%arg0: i32, %arg1: i32) -> (i32, i32) {
    %c0_i32 = arith.constant 0 : i32
    %c0_i32_0 = arith.constant 0 : i32
    %c0_i32_1 = arith.constant 0 : i32
    return %c0_i32, %c0_i32_0 : i32, i32
  }
  func.func @transform_5(%arg0: i32, %arg1: i32) -> (i32, i32) {
    %c0_i32 = arith.constant 0 : i32
    %c0_i32_0 = arith.constant 0 : i32
    %c0_i32_1 = arith.constant 0 : i32
    return %c0_i32, %c0_i32_0 : i32, i32
  }
  func.func @transform_6(%arg0: i32, %arg1: i32) -> i32 {
    %c0_i32 = arith.constant 0 : i32
    %c0_i32_0 = arith.constant 0 : i32
    return %c0_i32 : i32
  }
  func.func @transform_7(%arg0: i32, %arg1: i32) -> (i32, i32, i32) {
    %c0_i32 = arith.constant 0 : i32
    %c0_i32_0 = arith.constant 0 : i32
    %c0_i32_1 = arith.constant 0 : i32
    return %arg0, %c0_i32, %c0_i32_0 : i32, i32, i32
  }
}

</mosaic_0001>

<bundles_post_ra>
// kernel: tpu_custom_call.1
= control target key start
LH: loop header
LB: loop body
LE: loop exit
PB: predicated region body
PF: predicated region fallthrough
CT: control target
= control target key end

     0   :  { %s1635_s0 = inlined_call_operand.hbm [shape: bf16[2,64,128], index: 0, kind: input, shape index: {}]   ;;  %s1636_s1 = inlined_call_operand.hbm [shape: bf16[128,128], index: 1, kind: input, shape index: {}]   ;;  %s1637_s2 = inlined_call_operand.vmem [shape: f32[1,128], index: 2, kind: input, shape index: {}]   ;;  %s1638_s3 = inlined_call_operand.hbm [shape: bf16[128,128], index: 3, kind: input, shape index: {}]   ;;  %s1639_s4 = inlined_call_operand.vmem [shape: f32[1,128], index: 4, kind: input, shape index: {}]   ;;  %s1640_s5 = inlined_call_operand.vmem [shape: f32[1,128], index: 5, kind: input, shape index: {}]   ;;  %s1641_s6 = inlined_call_operand.<no memory space> [shape: f32[1], index: 6, kind: input, shape index: {}]   ;;  %s1642_s7 = inlined_call_operand.hbm [shape: f32[2,1,128], index: 7, kind: output, shape index: {}]  }
   0x1   :  { %1645 = sst [smem:[#allocation14_spill]] %s1636_s1 }
   0x2   :  { %1646 = sst [smem:[#allocation15_spill]] %s1638_s3 }
   0x3   :  { %12 = sst [smem:[#allocation3]] %s1641_s6 }
   0x4   :  { %13 = vsyncpa [#allocation5], 0 }
   0x5   :  { %15 = vsyncpa [#allocation5 + $0x1], 0 }
   0x6   :  { %16 = vsyncpa [#allocation8], 0 }
   0x7   :  { %17 = vsyncpa [#allocation6], 0 }
   0x8   :  { %19 = vsyncpa [#allocation6 + $0x1], 0  ;;  %s1430_s26 = smov 0   ;;  %s1432_s27 = smov 0  }
   0x9   :  { %s1434_s28 = smov 0   ;;  %s1436_s29 = smov 0  }
   0xa   :  { %s1438_s30 = smov 0   ;;  %s1440_s8 = smov 0  }
   0xb LB: > { %s915_s6 = sadd.s32 4294967295, %s1378_s8   ;;  %s916_s9 = sadd.s32 4294967294, %s1378_s8   ;;  %s1378_s8 = sphi %s1440_s8, %s25_s8   ;;  %s1374_s30 = sphi %s1438_s30, %s1665_s30   ;;  %s1370_s29 = sphi %s1436_s29, %s1664_s29   ;;  %s1366_s28 = sphi %s1434_s28, %s1663_s28   ;;  %s1362_s27 = sphi %s1432_s27, %s1662_s27   ;;  %s1358_s26 = sphi %s1430_s26, %s1661_s26  }
   0xc   : > { %p59_p0 = scmp.ne.s32.totalorder %s1362_s27, %s1358_s26  ;;  %p1464_p1 = scmp.eq.s32.totalorder %s915_s6, 0 }
   0xd   : > { %p1468_p2 = scmp.eq.s32.totalorder %s915_s6, 1  ;;  %p215_p3 = scmp.eq.s32.totalorder %s916_s9, 1 }
   0xe   : > { %p1474_p4 = por %p1464_p1, %p59_p0  ;;  %p917_p5 = scmp.ge.s32.totalorder %s1378_s8, 1 }
   0xf   : > { %p1479_p6 = por %p215_p3, %p59_p0  ;;  %p222_p7 = scmp.lt.s32.totalorder %s1378_s8, 3 }
  0x10   : > { %s1380_s15 = smov [#allocation7]   ;;  %s1381_s18 = smov [#allocation9]  }
  0x11   : > { %s1650_s13 = scalar_select %p1479_p6, 1, 0 }
  0x12   : > { %p1484_p8 = pnand %p917_p5, %p222_p7  ;;  %s234_s16 = sshll.u32 %s1380_s15, 4  ;;  %s235_s16 = int_to_ptr.vmem [resolvable:$true] %s234_s16 }
  0x13   : > { %s250_s19 = sshll.u32 %s1381_s18, 4  ;;  %s1225_s20 = scalar_lea.vmem %s235_s16, 1024  ;;  %s251_s19 = int_to_ptr.vmem [resolvable:$true] %s250_s19 }
  0x14   : > { %p1056_p9 = pneg %p1484_p8  ;;  %p1226_p13 = scmp.ne.s32.totalorder %s235_s16, %s1225_s20 }
  0x15   : > { %p1233_p5 = scmp.lt.s32.totalorder %s235_s16, %s235_s16  ;;  %p1234_p7 = scmp.lt.s32.totalorder %s1225_s20, %s1225_s20 }
  0x16   : > { %p1493_p11 = pnand %p1056_p9, %p1464_p1 }
  0x17   : > { %p1235_p10 = por %p1234_p7, %p1233_p5 }
  0x18   : > { %p1216_p12 = pneg %p1493_p11 }
  0x1a   : > { %p1228_p0 = pnand %p1226_p13, %p1216_p12 }
  0x1c   : > { %p1229_p3 = pneg %p1228_p0 }
  0x1e   : > { %p1236_p9 = pnand %p1235_p10, %p1229_p3 }
  0x20   : > { %1239 = shalt.err (!%p1236_p9)
}
  0x21   : > { %s1643_s21 = smov 64   ;;  %s1644_s22 = smov 4  }
  0x22   : > { %s1653_s1 = sld [smem:[#allocation14_spill]]  ;;  %s1251_s25 = scalar_lea.vmem %s251_s19, 1024 }
  0x23   : > { %p1252_p13 = scmp.ne.s32.totalorder %s251_s19, %s1251_s25  ;;  %p1259_p10 = scmp.lt.s32.totalorder %s251_s19, %s251_s19 }
  0x24   : > { %p1260_p3 = scmp.lt.s32.totalorder %s1251_s25, %s1251_s25 }
  0x25   : > { %p1254_p0 = pnand %p1252_p13, %p1216_p12 }
  0x26   : > { %p1261_p7 = por %p1260_p3, %p1259_p10 }
  0x27   : > { %p1255_p5 = pneg %p1254_p0 }
  0x28   : > { %1059 = dma.hbm_to_vmem [thread:$0]  (!%p1493_p11), %s1653_s1, 1024, %s235_s16, [#allocation8], %s1643_s21, %s1643_s21, %s1644_s22  }
  0x29   : > { %p1262_p9 = pnand %p1261_p7, %p1255_p5 }
  0x2b   : > { %1265 = shalt.err (!%p1262_p9)
}
  0x2c   : > { %s1654_s3 = sld [smem:[#allocation15_spill]]  ;;  %s37_s15 = sadd.s32 1, %s1374_s30 }
  0x2d   : > { %s46_s16 = sadd.s32 1, %s1366_s28  ;;  %p39_p12 = scmp.ge.s32.totalorder %s37_s15, 2 }
  0x2e   : > { %p53_p13 = scmp.ne.s32.totalorder %s1366_s28, %s1362_s27  ;;  %p54_p0 = scmp.eq.s32.totalorder %s1378_s8, 0 }
  0x2f   : > { %p1073_p5 = scmp.lt.s32.totalorder %s1378_s8, 2  ;;  %s1667_s15 = smov (%p39_p12, %s37_s15), 0 }
  0x30   : > { %p55_p10 = por %p54_p0, %p53_p13  ;;  %p1531_p3 = por %p1468_p2, %p53_p13 }
  0x31   : > { %s41_s18 = ssub.s32 %s1374_s30, %s1667_s15  ;;  %s273_s20 = sand.u32 1, %s1366_s28  }
  0x32   : > { %1062 = dma.hbm_to_vmem [thread:$0]  (!%p1493_p11), %s1654_s3, 1024, %s251_s19, [#allocation8], %s1643_s21, %s1643_s21, %s1644_s22  }
  0x33   : > { %p44_p7 = scmp.eq.s32.totalorder %s41_s18, 0  ;;  %s921_s19 = sshll.u32 %s273_s20, 5 }
  0x34   : > { %s969_s23 = sshll.u32 %s1374_s30, 9  ;;  %s277_s21 = scalar_lea.vmem [#allocation4], %s921_s19 }
  0x35   : > { %s1540_s24 = scalar_select %p44_p7, %s1366_s28, %s46_s16  }
  0x36   : > { %s285_s9 = scalar_lea.hbm %s1635_s0, %s969_s23  ;;  %s286_s22 = sshll.u32 %s277_s21, 4  ;;  %s287_s22 = int_to_ptr.vmem [resolvable:$true] %s286_s22 }
  0x37   : > { %p1547_p11 = pnand %p1073_p5, %p55_p10  ;;  %s274_s1 = scalar_lea.sflag [#allocation5], %s273_s20 }
  0x38   : > { %s1279_s18 = scalar_lea.vmem %s287_s22, 512  ;;  %s1384_s16 = smov [#allocation4]  }
  0x39   : > { %p1268_p2 = pneg %p1547_p11  ;;  %p1280_p9 = scmp.ne.s32.totalorder %s287_s22, %s1279_s18 }
  0x3a   : > { %s1284_s3 = sshll.u32 %s1384_s16, 4  ;;  %s1285_s3 = int_to_ptr.vmem [resolvable:$false] %s1284_s3 }
  0x3b   : > { %p1282_p12 = pnand %p1280_p9, %p1268_p2  ;;  %s1286_s23 = scalar_lea.vmem %s1285_s3, 1024 }
  0x3c   : > { %p1287_p0 = scmp.lt.s32.totalorder %s287_s22, %s1285_s3  ;;  %p1288_p7 = scmp.lt.s32.totalorder %s1286_s23, %s1279_s18 }
  0x3d   : > { %p1283_p13 = pneg %p1282_p12 }
  0x3e   : > { %p1289_p6 = por %p1288_p7, %p1287_p0 }
  0x40   : > { %p1290_p5 = pnand %p1289_p6, %p1283_p13 }
  0x42   : > { %1293 = shalt.err (!%p1290_p5)
}
  0x43   : > { %s1657_s21 = smov 4   ;;  %s1658_s19 = smov 64  }
  0x44   : > { %1066 = dma.hbm_to_vmem [thread:$0]  (!%p1547_p11), %s285_s9, 512, %s287_s22, %s274_s1, %s1658_s19, %s1658_s19, %s1657_s21  }
  0x45   : > { %298 = sbr.rel (%p1484_p8) target bundleno = 838 (0x346), region = 48  ;;  %s1561_s20 = sand.u32 (!%p1484_p8), 1, %s1362_s27  }
  0x46   : > { %s925_s3 = sshll.u32 (!%p1484_p8), %s1561_s20, 5  ;;  %s301_s25 = scalar_lea.sflag (!%p1484_p8), [#allocation5], %s1561_s20 }
  0x47   : > { %s1565_s6 = scalar_lea.vmem (!%p1484_p8), [#allocation4], %s925_s3 }
  0x4a   : > { %1345 = dma.done.wait (%p1474_p4), %s301_s25, 512  }
  0x4b   : > { %1347 = vsyncadd (%p1474_p4), %s301_s25, 4294966784 }
  0x4c   : > { %1349 = dma.done.wait (%p1464_p1), [#allocation8], 2048  }
  0x4d   : > { %1351 = vsyncadd (%p1464_p1), [#allocation8], 4294965248  ;;  %v1130_v0 = vld [vmem:[#allocation7 + $0x38] sm:$0xff]   ;;  %v1131_v1 = vld [vmem:[#allocation7 + $0x30] sm:$0xff]   ;;  %vm791_vm0 = vcmask 1040384   ;;  %s802_s11 = sld [smem:[#allocation3]] }
  0x4e   : > { %994 = vmatprep.subr.bf16.mxu0 %v1130_v0  ;;  %v1132_v2 = vld [vmem:[#allocation7 + $0x28] sm:$0xff]   ;;  %v1133_v3 = vld [vmem:[#allocation7 + $0x20] sm:$0xff]   ;;  %v1134_v5 = vld [vmem:[#allocation7 + $0x18] sm:$0xff]   ;;  %s966_s18 = sshll.u32 %s1370_s29, 4  ;;  %s341_s16 = scalar_lea.vmem [#allocation10], %s1561_s20 }
  0x4f   : > { %995 = vmatpush3.bf16.msra.mxu0 %v1130_v0  ;;  %v1138_v4 = vld [vmem:[%s1565_s6] sm:$0xff]   ;;  %v1135_v6 = vld [vmem:[#allocation7 + $0x10] sm:$0xff]   ;;  %v1136_v7 = vld [vmem:[#allocation7 + $0x8] sm:$0xff]   ;;  %s819_s23 = sshll.u32 %s341_s16, 4  ;;  %s807_s1 = scalar_lea.sflag [#allocation6], %s1561_s20  ;;  %s820_s23 = int_to_ptr.vmem [resolvable:$true] %s819_s23 }
  0x50   : > { %996 = vmatprep.subr.bf16.mxu0 %v1131_v1  ;;  %1010 = vmatprep.mubr.bf16.mxu0 %v1138_v4  ;;  %v1137_v8 = vld [vmem:[#allocation7] sm:$0xff]   ;;  %v1139_v9 = vld [vmem:[%s1565_s6 + $0x8] sm:$0xff]   ;;  %v1140_v10 = vld [vmem:[%s1565_s6 + $0x10] sm:$0xff]   ;;  %s1294_s10 = scalar_lea.vmem %s820_s23, 16  ;;  %s1386_s12 = smov [#allocation10]  }
  0x51   : > { %v1141_v11 = vld [vmem:[%s1565_s6 + $0x18] sm:$0xff]   ;;  %v1143_v13 = vld [vmem:[#allocation9 + $0x30] sm:$0xff]   ;;  %v1144_v14 = vld [vmem:[#allocation9 + $0x28] sm:$0xff]   ;;  %s1593_s6 = scalar_lea.hbm %s1642_s7, %s966_s18  ;;  %p1295_p1 = scmp.ne.s32.totalorder %s820_s23, %s1294_s10 }
  0x52   : > { %v1142_v12 = vld [vmem:[#allocation9 + $0x38] sm:$0xff]   ;;  %v1145_v15 = vld [vmem:[#allocation9 + $0x20] sm:$0xff]   ;;  %v1147_v17 = vld [vmem:[#allocation9 + $0x10] sm:$0xff]   ;;  %s1298_s29 = sshll.u32 %s1386_s12, 4  ;;  %s1299_s29 = int_to_ptr.vmem [resolvable:$false] %s1298_s29 }
  0x53   : > { %997 = vmatpush3.bf16.msra.mxu0 %v1131_v1  ;;  %1018 = vmatprep.subr.bf16.mxu1 %v1142_v12  ;;  %v1146_v16 = vld [vmem:[#allocation9 + $0x18] sm:$0xff]   ;;  %v1148_v18 = vld [vmem:[#allocation9 + $0x8] sm:$0xff]   ;;  %v1149_v19 = vld [vmem:[#allocation9] sm:$0xff]   ;;  %p1296_p4 = pnand %p1295_p1, %p1531_p3  ;;  %s1300_s14 = scalar_lea.vmem %s1299_s29, 32 }
  0x54   : > { %998 = vmatprep.subr.bf16.mxu0 %v1132_v2  ;;  %1019 = vmatpush3.bf16.msra.mxu1 %v1142_v12  ;;  %v928_v20 = vld [vmem:[%s1637_s2] ss:$0 sm:$0xff]  ;;  %p1301_p8 = scmp.lt.s32.totalorder %s820_s23, %s1299_s29  ;;  %p1302_p10 = scmp.lt.s32.totalorder %s1300_s14, %s1294_s10 }
  0x55   : > { %1020 = vmatprep.subr.bf16.mxu1 %v1143_v13  ;;  %p1297_p6 = pneg %p1296_p4 }
  0x56   : > { %p1303_p11 = por %p1302_p10, %p1301_p8 }
  0x57   : > { %999 = vmatpush3.bf16.msra.mxu0 %v1132_v2 }
  0x58   : > { %1000 = vmatprep.subr.bf16.mxu0 %v1133_v3  ;;  %1021 = vmatpush3.bf16.msra.mxu1 %v1143_v13  ;;  %p1304_p2 = pnand %p1303_p11, %p1297_p6 }
  0x59   : > { %1022 = vmatprep.subr.bf16.mxu1 %v1144_v14 }
  0x5b   : > { %1001 = vmatpush3.bf16.msra.mxu0 %v1133_v3 }
  0x5c   : > { %1002 = vmatprep.subr.bf16.mxu0 %v1134_v5  ;;  %1023 = vmatpush3.bf16.msra.mxu1 %v1144_v14 }
  0x5d   : > { %1024 = vmatprep.subr.bf16.mxu1 %v1145_v15 }
  0x5f   : > { %1003 = vmatpush3.bf16.msra.mxu0 %v1134_v5 }
  0x60   : > { %1004 = vmatprep.subr.bf16.mxu0 %v1135_v6  ;;  %1025 = vmatpush3.bf16.msra.mxu1 %v1145_v15 }
  0x61   : > { %1026 = vmatprep.subr.bf16.mxu1 %v1146_v16 }
  0x63   : > { %1005 = vmatpush3.bf16.msra.mxu0 %v1135_v6 }
  0x64   : > { %1006 = vmatprep.subr.bf16.mxu0 %v1136_v7  ;;  %1027 = vmatpush3.bf16.msra.mxu1 %v1146_v16 }
  0x65   : > { %1028 = vmatprep.subr.bf16.mxu1 %v1147_v17 }
  0x67   : > { %1007 = vmatpush3.bf16.msra.mxu0 %v1136_v7 }
  0x68   : > { %1008 = vmatprep.subr.bf16.mxu0 %v1137_v8  ;;  %1029 = vmatpush3.bf16.msra.mxu1 %v1147_v17  ;;  %v1385_v17 = vmov 0.0  }
  0x69   : > { %1030 = vmatprep.subr.bf16.mxu1 %v1148_v18  ;;  %348 = vst [vmem:[#allocation2] sm:$0x1] %v1385_v17 }
  0x6b   : > { %1009 = vmatpush3.bf16.msra.mxu0 %v1137_v8 }
  0x6c   : > { %1031 = vmatpush3.bf16.msra.mxu1 %v1148_v18  ;;  %v949_v18 = vld [vmem:[%s1639_s4] ss:$0 sm:$0xff] }
  0x6d   : > { %1032 = vmatprep.subr.bf16.mxu1 %v1149_v19 }
  0x6e   : > { %1011 = vmatmul.mubr.bf16.vlgmr.msra.gmra.mxu0 %v1139_v9 }
  0x6f   : > { %1014 = vmatprep.mubr.bf16.mxu0 %v1140_v10 }
  0x70   : > { %1033 = vmatpush3.bf16.msra.mxu1 %v1149_v19 }
  0x76   : > { %1015 = vmatmul.mubr.bf16.gmra.mxu0 %v1141_v11 }
 0x12e   : > { %v1012_v21 = vpop.f32.mrf.mxu0 }
 0x12f   : > { %v495_v22 = vadd.f32 %v1012_v21, %v928_v20 }
 0x130   : > { %v486_v23 = vpop.f32.mrf.mxu0 }
 0x131   : > { %v943_v24 = vmul.f32 -1.442695, %v495_v22  ;;  %v487_v25 = vadd.f32 %v928_v20, %v486_v23 }
 0x132   : > { %v1013_v26 = vpop.f32.mrf.mxu0 }
 0x133   : > { %v941_v27 = vmul.f32 -1.442695, %v487_v25  ;;  %v498_v28 = vadd.f32 %v1013_v26, %v928_v20  ;;  %1150 = vpow2.f32 %v943_v24 }
 0x134   : > { %v489_v29 = vpop.f32.mrf.mxu0 }
 0x135   : > { %1152 = vpow2.f32 %v941_v27  ;;  %v944_v30 = vmul.f32 -1.442695, %v498_v28  ;;  %v490_v31 = vadd.f32 %v928_v20, %v489_v29 }
 0x136   : > { %v1016_v32 = vpop.f32.mrf.mxu0 }
 0x137   : > { %1154 = vpow2.f32 %v944_v30  ;;  %v942_v33 = vmul.f32 -1.442695, %v490_v31  ;;  %v511_v34 = vadd.f32 %v1016_v32, %v928_v20 }
 0x138   : > { %v502_v35 = vpop.f32.mrf.mxu0 }
 0x139   : > { %1156 = vpow2.f32 %v942_v33  ;;  %v947_v36 = vmul.f32 -1.442695, %v511_v34  ;;  %v503_v37 = vadd.f32 %v928_v20, %v502_v35 }
 0x13a   : > { %v1017_v38 = vpop.f32.mrf.mxu0 }
 0x13b   : > { %v945_v39 = vmul.f32 -1.442695, %v503_v37  ;;  %v514_v40 = vadd.f32 %v1017_v38, %v928_v20  ;;  %1158 = vpow2.f32 %v947_v36 }
 0x13c   : > { %v505_v41 = vpop.f32.mrf.mxu0 }
 0x13d   : > { %1160 = vpow2.f32 %v945_v39  ;;  %v948_v42 = vmul.f32 -1.442695, %v514_v40  ;;  %v506_v43 = vadd.f32 %v928_v20, %v505_v41 }
 0x13f   : > { %1162 = vpow2.f32 %v948_v42  ;;  %v946_v44 = vmul.f32 -1.442695, %v506_v43 }
 0x140   : > { %v1151_v45 = vpop.eup %1150 }
 0x141   : > { %1164 = vpow2.f32 %v946_v44  ;;  %v543_v49 = vadd.f32 1.0, %v1151_v45 }
 0x142   : > { %v1153_v46 = vpop.eup %1152 }
 0x143   : > { %v541_v47 = vadd.f32 1.0, %v1153_v46 }
 0x144   : > { %v1155_v48 = vpop.eup %1154 }
 0x145   : > { %v544_v50 = vadd.f32 1.0, %v1155_v48  ;;  %1166 = vrcp.f32 %v541_v47 }
 0x146   : > { %v1157_v51 = vpop.eup %1156 }
 0x147   : > { %1168 = vrcp.f32 %v544_v50  ;;  %v542_v52 = vadd.f32 1.0, %v1157_v51 }
 0x148   : > { %1170 = vrcp.f32 %v543_v49  ;;  %v1159_v53 = vpop.eup %1158 }
 0x149   : > { %1172 = vrcp.f32 %v542_v52  ;;  %v547_v57 = vadd.f32 1.0, %v1159_v53 }
 0x14a   : > { %v1161_v54 = vpop.eup %1160 }
 0x14b   : > { %v545_v55 = vadd.f32 1.0, %v1161_v54 }
 0x14c   : > { %v1163_v56 = vpop.eup %1162 }
 0x14d   : > { %v548_v58 = vadd.f32 1.0, %v1163_v56  ;;  %1174 = vrcp.f32 %v545_v55 }
 0x14e   : > { %v1165_v59 = vpop.eup %1164 }
 0x14f   : > { %1176 = vrcp.f32 %v548_v58  ;;  %v546_v60 = vadd.f32 1.0, %v1165_v59 }
 0x150   : > { %1178 = vrcp.f32 %v547_v57 }
 0x151   : > { %1180 = vrcp.f32 %v546_v60 }
 0x152   : > { %v1167_v61 = vpop.eup %1166 }
 0x153   : > { %v565_v2 = vmul.f32 %v1167_v61, %v487_v25 }
 0x154   : > { %v1169_v62 = vpop.eup %1168 }
 0x155   : > { %v1171_v63 = vpop.eup %1170  ;;  %v568_v1 = vmul.f32 %v1169_v62, %v498_v28 }
 0x156   : > { %v1173_v0 = vpop.eup %1172  ;;  %v567_v4 = vmul.f32 %v1171_v63, %v495_v22 }
 0x157   : > { %v566_v3 = vmul.f32 %v1173_v0, %v490_v31 }
 0x158   : > { %v574_v6 = vpack.c.bf16 %v568_v1, %v567_v4 }
 0x159   : > { %v573_v5 = vpack.c.bf16 %v566_v3, %v565_v2 }
 0x15a   : > { %v1175_v7 = vpop.eup %1174 }
 0x15b   : > { %1034 = vmatprep.mubr.bf16.mxu1 %v573_v5  ;;  %v569_v12 = vmul.f32 %v1175_v7, %v503_v37 }
 0x15c   : > { %v1177_v8 = vpop.eup %1176  ;;  %1035 = vmatmul.mubr.bf16.vlgmr.msra.gmra.mxu1 %v574_v6 }
 0x15d   : > { %v1179_v9 = vpop.eup %1178  ;;  %v572_v11 = vmul.f32 %v1177_v8, %v514_v40 }
 0x15e   : > { %v1181_v10 = vpop.eup %1180  ;;  %v571_v14 = vmul.f32 %v1179_v9, %v511_v34 }
 0x15f   : > { %v570_v13 = vmul.f32 %v1181_v10, %v506_v43 }
 0x160   : > { %v576_v16 = vpack.c.bf16 %v572_v11, %v571_v14 }
 0x161   : > { %v575_v15 = vpack.c.bf16 %v570_v13, %v569_v12 }
 0x163   : > { %1038 = vmatprep.mubr.bf16.mxu1 %v575_v15 }
 0x164   : > { %1039 = vmatmul.mubr.bf16.gmra.mxu1 %v576_v16 }
 0x21c   : > { %v1036_v19 = vpop.f32.mrf.mxu1 }
 0x21d   : > { %v691_v20 = vadd.f32 %v1036_v19, %v949_v18 }
 0x21e   : > { %v682_v21 = vpop.f32.mrf.mxu1 }
 0x21f   : > { %v960_v22 = vmul.f32 -1.442695, %v691_v20  ;;  %v683_v23 = vadd.f32 %v949_v18, %v682_v21 }
 0x220   : > { %v1037_v24 = vpop.f32.mrf.mxu1 }
 0x221   : > { %v958_v25 = vmul.f32 -1.442695, %v683_v23  ;;  %v694_v26 = vadd.f32 %v1037_v24, %v949_v18  ;;  %1182 = vpow2.f32 %v960_v22 }
 0x222   : > { %v685_v27 = vpop.f32.mrf.mxu1 }
 0x223   : > { %1184 = vpow2.f32 %v958_v25  ;;  %v961_v28 = vmul.f32 -1.442695, %v694_v26  ;;  %v686_v29 = vadd.f32 %v949_v18, %v685_v27 }
 0x224   : > { %v1040_v30 = vpop.f32.mrf.mxu1 }
 0x225   : > { %1186 = vpow2.f32 %v961_v28  ;;  %v959_v31 = vmul.f32 -1.442695, %v686_v29  ;;  %v707_v32 = vadd.f32 %v1040_v30, %v949_v18 }
 0x226   : > { %v698_v33 = vpop.f32.mrf.mxu1 }
 0x227   : > { %1188 = vpow2.f32 %v959_v31  ;;  %v964_v34 = vmul.f32 -1.442695, %v707_v32  ;;  %v699_v35 = vadd.f32 %v949_v18, %v698_v33 }
 0x228   : > { %v1041_v36 = vpop.f32.mrf.mxu1 }
 0x229   : > { %v962_v37 = vmul.f32 -1.442695, %v699_v35  ;;  %v710_v38 = vadd.f32 %v1041_v36, %v949_v18  ;;  %1190 = vpow2.f32 %v964_v34 }
 0x22a   : > { %v701_v39 = vpop.f32.mrf.mxu1 }
 0x22b   : > { %1192 = vpow2.f32 %v962_v37  ;;  %v965_v40 = vmul.f32 -1.442695, %v710_v38  ;;  %v702_v41 = vadd.f32 %v949_v18, %v701_v39 }
 0x22d   : > { %1194 = vpow2.f32 %v965_v40  ;;  %v963_v42 = vmul.f32 -1.442695, %v702_v41 }
 0x22e   : > { %v1183_v43 = vpop.eup %1182 }
 0x22f   : > { %1196 = vpow2.f32 %v963_v42  ;;  %v739_v47 = vadd.f32 1.0, %v1183_v43 }
 0x230   : > { %v1185_v44 = vpop.eup %1184 }
 0x231   : > { %v737_v45 = vadd.f32 1.0, %v1185_v44 }
 0x232   : > { %v1187_v46 = vpop.eup %1186 }
 0x233   : > { %1198 = vrcp.f32 %v737_v45  ;;  %v740_v49 = vadd.f32 1.0, %v1187_v46 }
 0x234   : > { %v1189_v48 = vpop.eup %1188  ;;  %1200 = vrcp.f32 %v739_v47 }
 0x235   : > { %v738_v50 = vadd.f32 1.0, %v1189_v48 }
 0x236   : > { %v1191_v51 = vpop.eup %1190 }
 0x237   : > { %1202 = vrcp.f32 %v738_v50  ;;  %v743_v55 = vadd.f32 1.0, %v1191_v51 }
 0x238   : > { %v1193_v52 = vpop.eup %1192  ;;  %1204 = vrcp.f32 %v740_v49 }
 0x239   : > { %v741_v53 = vadd.f32 1.0, %v1193_v52 }
 0x23a   : > { %v1195_v54 = vpop.eup %1194 }
 0x23b   : > { %1206 = vrcp.f32 %v741_v53  ;;  %v744_v57 = vadd.f32 1.0, %v1195_v54 }
 0x23c   : > { %v1197_v56 = vpop.eup %1196  ;;  %1208 = vrcp.f32 %v743_v55 }
 0x23d   : > { %v742_v58 = vadd.f32 1.0, %v1197_v56 }
 0x23f   : > { %1210 = vrcp.f32 %v742_v58 }
 0x240   : > { %1212 = vrcp.f32 %v744_v57  ;;  %v1199_v59 = vpop.eup %1198 }
 0x241   : > { %v1201_v60 = vpop.eup %1200  ;;  %v761_v62 = vmul.f32 %v1199_v59, %v683_v23  ;;  %v769_v23 = vld [vmem:[#allocation2] sm:$0x1] }
 0x242   : > { %v763_v1 = vmul.f32 %v1201_v60, %v691_v20 }
 0x244   : > { %v1203_v61 = vpop.eup %1202 }
 0x245   : > { %v762_v63 = vmul.f32 %v1203_v61, %v686_v29  ;;  %v1205_v0 = vpop.eup %1204 }
 0x246   : > { %v764_v4 = vmul.f32 %v1205_v0, %v694_v26  ;;  %v789_v26 = vld [vmem:[%s1640_s5] sm:$0x1] }
 0x247   : > { %v770_v2 = vadd.f32 %v762_v63, %v761_v62 }
 0x248   : > { %v1207_v3 = vpop.eup %1206 }
 0x249   : > { %v771_v5 = vadd.f32 %v770_v2, %v763_v1  ;;  %v1209_v6 = vpop.eup %1208  ;;  %v765_v7 = vmul.f32 %v1207_v3, %v699_v35 }
 0x24a   : > { %v767_v13 = vmul.f32 %v1209_v6, %v707_v32 }
 0x24b   : > { %v772_v8 = vadd.f32 %v771_v5, %v764_v4 }
 0x24c   : > { %v1211_v9 = vpop.eup %1210 }
 0x24d   : > { %v773_v10 = vadd.f32 %v772_v8, %v765_v7  ;;  %v766_v11 = vmul.f32 %v1211_v9, %v702_v41  ;;  %v1213_v12 = vpop.eup %1212 }
 0x24e   : > { %v768_v15 = vmul.f32 %v1213_v12, %v710_v38 }
 0x24f   : > { %v774_v14 = vadd.f32 %v773_v10, %v766_v11 }
 0x251   : > { %v775_v16 = vadd.f32 %v774_v14, %v767_v13 }
 0x253   : > { %v776_v17 = vadd.f32 %v775_v16, %v768_v15 }
 0x255   : > { %v777_v18 = vrot.slane %v776_v17, 4 }
 0x257   : > { %v778_v19 = vadd.f32 %v777_v18, %v776_v17 }
 0x259   : > { %v779_v21 = vrot.slane %v778_v19, 2 }
 0x25b   : > { %v780_v20 = vadd.f32 %v779_v21, %v778_v19 }
 0x25d   : > { %v781_v22 = vrot.slane %v780_v20, 1 }
 0x25f   : > { %v782_v24 = vadd.f32 %v781_v22, %v780_v20 }
 0x261   : > { %v783_v25 = vadd.f32 %v782_v24, %v769_v23 }
 0x263   : > { %784 = vst [vmem:[#allocation2] sm:$0x1] %v783_v25 }
 0x26a   : > { %v788_v27 = vld [vmem:[#allocation2] sm:$0x1] }
 0x26b   : > { %v790_v28 = vmul.f32 %v789_v26, %v788_v27 }
 0x26d   : > { %v792_v29 = vsel %vm791_vm0, %v790_v28, 0.0 }
 0x26e   : > { %793 = vadd.xlane.f32.xlu0 %v792_v29 }
 0x2f7   : > { %v794_v30 = vpop.xlane.xlu0 %793 }
 0x2f8   : > { %v795_v31 = vrot.slane %v794_v30, 4 }
 0x2fa   : > { %v796_v32 = vadd.f32 %v795_v31, %v794_v30 }
 0x2fc   : > { %v797_v33 = vrot.slane %v796_v32, 2 }
 0x2fe   : > { %v798_v34 = vadd.f32 %v797_v33, %v796_v32 }
 0x300   : > { %v799_v35 = vrot.slane %v798_v34, 1 }
 0x302   : > { %v800_v36 = vadd.f32 %v799_v35, %v798_v34 }
 0x304   : > { %1042 = vpush %v800_v36 }
 0x335   : > { %s1043_s21 = spop %1042 }
 0x336   : > { %s803_s19 = sadd.f32 %s1043_s21, %s802_s11 }
 0x338   : > { %v804_v37 = vstv %s803_s19 }
 0x339   : > { %805 = vst [vmem:[%s341_s16] sm:$0x1] %v804_v37 }
 0x33a   : > { %1307 = shalt.err (!%p1304_p2)
}
 0x33b   : > { %s1308_s22 = scalar_lea.hbm %s1593_s6, 16  ;;  %s1312_s11 = scalar_lea.hbm %s1642_s7, 32 }
 0x33c   : > { %p1309_p9 = scmp.ne.s32.totalorder %s1593_s6, %s1308_s22  ;;  %p1313_p0 = scmp.lt.s32.totalorder %s1593_s6, %s1642_s7 }
 0x33d   : > { %p1314_p7 = scmp.lt.s32.totalorder %s1312_s11, %s1308_s22 }
 0x33e   : > { %p1310_p12 = pnand %p1309_p9, %p1531_p3 }
 0x33f   : > { %p1315_p5 = por %p1314_p7, %p1313_p0 }
 0x340   : > { %p1311_p13 = pneg %p1310_p12 }
 0x342   : > { %p1316_p1 = pnand %p1315_p5, %p1311_p13 }
 0x344   : > { %1319 = shalt.err (!%p1316_p1)
}
 0x345   : > { %1054 = dma.vmem_to_hbm [thread:$0]  (%p1531_p3), %s820_s23, 16, %s1593_s6, %s807_s1  }
 0x346 PF: > { %s831_s21 = sand.u32 1, %s1358_s26   ;;  %p1659_p4 = scmp.ne.s32.totalorder %s1650_s13, 0 }
 0x347   : > { %p1660_p6 = scmp.ge.s32.totalorder %s1378_s8, 2  ;;  %s832_s19 = scalar_lea.sflag [#allocation6], %s831_s21 }
 0x349   : > { %p1068_p8 = pnand %p1660_p6, %p1659_p4 }
 0x34b   : > { %p1069_p10 = pneg %p1068_p8 }
 0x34d   : > { %1353 = dma.done.wait (%p1069_p10), %s832_s19, 16  }
 0x34e   : > { %1355 = vsyncadd (%p1069_p10), %s832_s19, 4294967280  ;;  %s25_s8 = sadd.s32 1, %s1378_s8   ;;  %s1661_s26 = smov %s1362_s27 }
 0x34f   : > { %p22_p11 = scmp.ge.s32.totalorder %s25_s8, 4   ;;  %s1662_s27 = smov %s1366_s28 }
 0x350   : > { %s1663_s28 = smov %s1540_s24  ;;  %s1664_s29 = smov %s1374_s30 }
 0x351   : > { %s1665_s30 = smov %s1667_s15  ;;  %24 = sbr.rel (!%p22_p11) target bundleno = 11 (0xb), region = 109 }
 0x356   :  { %836 = vsyncpa [#allocation5], 1 }
 0x357   :  { %838 = vsyncpa [#allocation5 + $0x1], 1 }
 0x358   :  { %839 = vsyncpa [#allocation8], 1 }
 0x359   :  { %840 = vsyncpa [#allocation6], 1 }
 0x35a   :  { %842 = vsyncpa [#allocation6 + $0x1], 1 }

</bundles_post_ra>
